<compile_context>
chip_gen: v7x
topology: tpu7x:2x2x1
jax: 0.10.0
libtpu: 0.0.40
codegen_flags: <defaults>
</compile_context>

<pallas_src>
import functools

import jax
import jax.numpy as jnp
from jax.experimental import pallas as pl
from jax.experimental.pallas import tpu as pltpu

NEG_BIG = -1.0e30


# ----------------------------------------------------------------------------
# Single fused kernel (tiled over points):
#   running point->frame max pool, then (last tile only) frame->seq max pool,
#   frame heads and sequence heads.
# ----------------------------------------------------------------------------
def _fused_kernel(tile_lo_ref, tile_hi_ref,                 # scalar prefetch
                  x_ref, p2f_ref, f2b_ref, bbox_ref,
                  wf_ref, bf_ref, ws_ref, bs_ref,
                  frame_out_ref, seq_out_ref,
                  frame_pooled, seq_pooled):
    # tile_lo/hi : (num_tiles,) int32 in SMEM  first/last frame id in the tile
    # x_ref      : (TILE_N, D) f32    per-point features (current tile)
    # p2f_ref    : (TILE_N, 1) int32  point -> frame id (-1 for padded rows)
    # f2b_ref    : (F, 1) int32       frame -> sequence id
    # bbox_ref   : (F, 8) f32         [center(3), 0,0,0, cos_yaw, sin_yaw]
    # wf_ref     : (D, 8),  bf_ref: (1, 8)        fused frame-level weights
    # ws_ref     : (D, 4nb), bs_ref: (1, 4nb)     fused seq-level weights
    # frame_out_ref: (F, 8)   [center(3), vel(3), yaw_sincos(2)]
    # seq_out_ref  : (B, 4nb) [size_residual(3nb), size_bin(nb)]
    # frame_pooled : VMEM scratch (F, D) running-max accumulator
    # seq_pooled   : VMEM scratch (B, D)
    t = pl.program_id(0)
    num_seqs = seq_pooled.shape[0]

    # ---- init the running-max accumulator on the first tile -----------------
    @pl.when(t == 0)
    def _():
        frame_pooled[...] = jnp.full(frame_pooled.shape, NEG_BIG,
                                     dtype=frame_pooled.dtype)

    # ---- point -> frame segment max for this point tile ---------------------
    x_t = x_ref[...]                     # (TILE_N, D), loaded once
    p2f_t = p2f_ref[...]                 # (TILE_N, 1)
    lo = tile_lo_ref[t]
    hi = tile_hi_ref[t]

    # Only loop over frames present in this tile (scalar-prefetched range).
    @pl.loop(0, hi - lo + 1)
    def _(i):
        s = lo + i
        part = jnp.max(jnp.where(p2f_t == s, x_t, NEG_BIG),
                       axis=0, keepdims=True)                     # (1, D)
        cur = frame_pooled[pl.ds(s, 1), :]
        frame_pooled[pl.ds(s, 1), :] = jnp.maximum(cur, part)

    # ---- finalize on the last tile: frame->seq pool + heads + stores --------
    @pl.when(t == pl.num_programs(0) - 1)
    def _():
        fp = frame_pooled[...]           # (F, D)
        f2b = f2b_ref[...]               # (F, 1)

        # frame -> sequence max pooling (num_seqs small & static: unrolled)
        for b in range(num_seqs):
            seq_pooled[pl.ds(b, 1), :] = jnp.max(
                jnp.where(f2b == b, fp, NEG_BIG), axis=0, keepdims=True)

        # frame-level heads: one fused (D, 8) matmul
        y = jnp.dot(fp, wf_ref[...],
                    preferred_element_type=jnp.float32) + bf_ref[...]   # (F,8)
        bbox8 = bbox_ref[...]            # (F, 8)
        c = bbox8[:, 6:7]
        sn = bbox8[:, 7:8]
        s0 = y[:, 6:7]
        s1 = y[:, 7:8]
        y0 = c * s0 + sn * s1            # rot_mats = [[c, s], [-s, c]]
        y1 = -sn * s0 + c * s1
        col8 = jax.lax.broadcasted_iota(jnp.int32, y.shape, 1)
        # cols 0-2: +bbox center (bbox8 cols 3-5 are zero); cols 6,7: rotated yaw
        frame_out_ref[...] = jnp.where(
            col8 == 6, y0, jnp.where(col8 == 7, y1, y + bbox8))

        # sequence-level heads: one fused (D, 4*nb) matmul + masked softmax
        z = jnp.dot(seq_pooled[...], ws_ref[...],
                    preferred_element_type=jnp.float32) + bs_ref[...]   # (B,4nb)
        nb = z.shape[1] // 4
        colz = jax.lax.broadcasted_iota(jnp.int32, z.shape, 1)
        is_bin = colz >= 3 * nb
        m = jnp.max(jnp.where(is_bin, z, NEG_BIG), axis=1, keepdims=True)
        e = jnp.exp(jnp.where(is_bin, z - m, NEG_BIG))
        inv = pl.reciprocal(jnp.sum(e, axis=1, keepdims=True), approx=True)
        seq_out_ref[...] = jnp.where(is_bin, e * inv, z)


# ----------------------------------------------------------------------------
# Parameter init (deterministic, synthetic; mimics nn.Linear uniform bounds)
# ----------------------------------------------------------------------------
def init_params(key, featsize, num_size_bins):
    def linear(k, fan_in, fan_out):
        kw, kb = jax.random.split(k)
        bound = 1.0 / (fan_in ** 0.5)
        w = jax.random.uniform(kw, (fan_in, fan_out), jnp.float32, -bound, bound)
        b = jax.random.uniform(kb, (fan_out,), jnp.float32, -bound, bound)
        return w, b

    k1, k2, k3, k4, k5 = jax.random.split(key, 5)
    p = {}
    p["w_center"], p["b_center"] = linear(k1, featsize, 3)
    p["w_yaw"], p["b_yaw"] = linear(k2, featsize, 2)
    p["w_vel"], p["b_vel"] = linear(k3, featsize, 3)
    p["w_bin"], p["b_bin"] = linear(k4, featsize, num_size_bins)
    p["w_resid"], p["b_resid"] = linear(k5, featsize, num_size_bins * 3)
    return p


def fuse_params(p):
    """Pre-fuse the per-level Linear weights once (outside the jitted forward)."""
    return {
        "w_frame": jnp.concatenate(
            [p["w_center"], p["w_vel"], p["w_yaw"]], axis=1),              # (D, 8)
        "b_frame": jnp.concatenate(
            [p["b_center"], p["b_vel"], p["b_yaw"]]).reshape(1, -1),       # (1, 8)
        "w_seq": jnp.concatenate([p["w_resid"], p["w_bin"]], axis=1),      # (D, 4nb)
        "b_seq": jnp.concatenate([p["b_resid"], p["b_bin"]]).reshape(1, -1),
    }


# ----------------------------------------------------------------------------
# Forward pass: one pallas_call with a point-tile grid + scalar prefetch.
# ----------------------------------------------------------------------------
def _round_up(v, m):
    return (v + m - 1) // m * m


def _vmem_limit_bytes():
    # Half the physical VMEM, capped at 64 MiB:
    #   v5e/v6e (128 MiB phys) -> 64 MiB ; v7x (64 MiB phys) -> 32 MiB.
    try:
        cap = int(pltpu.get_tpu_info().vmem_capacity_bytes)
    except Exception:
        cap = 64 * 1024 * 1024
    return int(min(64 * 1024 * 1024, cap // 2))


@functools.partial(jax.jit,
                   static_argnames=("num_frames", "num_seqs", "tile_n"))
def refinement_bbox_regression(fused, x, bb_center, bb_cos, bb_sin,
                               point2frameidx, frame2batchidx,
                               num_frames, num_seqs, tile_n=512):
    n, d = x.shape
    nb4 = fused["w_seq"].shape[1]          # 4 * num_size_bins

    # ---- tiling over the point dimension ------------------------------------
    tn = min(tile_n, _round_up(n, 8))      # multiple of 8 sublanes
    n_pad = _round_up(n, tn)
    num_tiles = n_pad // tn

    x_pad = jnp.pad(x, ((0, n_pad - n), (0, 0)))
    p2f = point2frameidx.astype(jnp.int32)
    p2f_pad = jnp.pad(p2f, (0, n_pad - n), constant_values=-1)

    # Per-tile frame-id ranges (scalar prefetch): restricts the in-kernel
    # segment loop to frames actually present in each point tile.
    p2f_tiles = p2f_pad.reshape(num_tiles, tn)
    valid = p2f_tiles >= 0
    tile_hi = jnp.max(jnp.where(valid, p2f_tiles, -1), axis=1).astype(jnp.int32)
    tile_lo = jnp.min(jnp.where(valid, p2f_tiles, jnp.int32(2 ** 30)), axis=1)
    tile_lo = jnp.where(tile_hi >= 0, tile_lo, 0).astype(jnp.int32)

    f2b = frame2batchidx.reshape(num_frames, 1).astype(jnp.int32)
    # bbox slab: [center(3), zeros(3), cos, sin] so the kernel needs no concat.
    bbox8 = jnp.concatenate(
        [bb_center, jnp.zeros((num_frames, 3), jnp.float32),
         bb_cos.reshape(-1, 1), bb_sin.reshape(-1, 1)], axis=1)        # (F, 8)

    grid_spec = pltpu.PrefetchScalarGridSpec(
        num_scalar_prefetch=2,
        grid=(num_tiles,),
        in_specs=[
            pl.BlockSpec((tn, d), lambda t, lo, hi: (t, 0)),           # x tile
            pl.BlockSpec((tn, 1), lambda t, lo, hi: (t, 0)),           # p2f tile
            pl.BlockSpec((num_frames, 1), lambda t, lo, hi: (0, 0)),   # f2b
            pl.BlockSpec((num_frames, 8), lambda t, lo, hi: (0, 0)),   # bbox8
            pl.BlockSpec((d, 8), lambda t, lo, hi: (0, 0)),            # w_frame
            pl.BlockSpec((1, 8), lambda t, lo, hi: (0, 0)),            # b_frame
            pl.BlockSpec((d, nb4), lambda t, lo, hi: (0, 0)),          # w_seq
            pl.BlockSpec((1, nb4), lambda t, lo, hi: (0, 0)),          # b_seq
        ],
        out_specs=[
            pl.BlockSpec((num_frames, 8), lambda t, lo, hi: (0, 0)),
            pl.BlockSpec((num_seqs, nb4), lambda t, lo, hi: (0, 0)),
        ],
        scratch_shapes=[pltpu.VMEM((num_frames, d), jnp.float32),
                        pltpu.VMEM((num_seqs, d), jnp.float32)],
    )

    frame_out, seq_out = pl.pallas_call(
        _fused_kernel,
        out_shape=(jax.ShapeDtypeStruct((num_frames, 8), jnp.float32),
                   jax.ShapeDtypeStruct((num_seqs, nb4), jnp.float32)),
        grid_spec=grid_spec,
        compiler_params=pltpu.CompilerParams(
            dimension_semantics=("arbitrary",),
            vmem_limit_bytes=_vmem_limit_bytes()),
    )(tile_lo, tile_hi,
      x_pad, p2f_pad.reshape(n_pad, 1), f2b, bbox8,
      fused["w_frame"], fused["b_frame"], fused["w_seq"], fused["b_seq"])

    nb = nb4 // 4
    centers = frame_out[:, 0:3]
    velocities = frame_out[:, 3:6]
    yaw_sincos = frame_out[:, 6:8]
    size_residual = seq_out[:, : 3 * nb]
    size_bin = seq_out[:, 3 * nb:]
    return centers, velocities, yaw_sincos, size_residual, size_bin


# ----------------------------------------------------------------------------
# Pure-JAX reference for the correctness check
# ----------------------------------------------------------------------------
def reference(params, x, bb_center, bb_cos, bb_sin, p2f, f2b, nf, ns):
    hp = jax.lax.Precision.HIGHEST
    fp = jax.ops.segment_max(x, p2f, num_segments=nf)
    sp = jax.ops.segment_max(fp, f2b, num_segments=ns)
    centers = jnp.dot(fp, params["w_center"], precision=hp) \
        + params["b_center"] + bb_center
    vel = jnp.dot(fp, params["w_vel"], precision=hp) + params["b_vel"]
    yaw = jnp.dot(fp, params["w_yaw"], precision=hp) + params["b_yaw"]
    y0 = bb_cos * yaw[:, 0] + bb_sin * yaw[:, 1]
    y1 = -bb_sin * yaw[:, 0] + bb_cos * yaw[:, 1]
    yaw = jnp.stack([y0, y1], axis=1)
    resid = jnp.dot(sp, params["w_resid"], precision=hp) + params["b_resid"]
    size_bin = jax.nn.softmax(
        jnp.dot(sp, params["w_bin"], precision=hp) + params["b_bin"], axis=1)
    return centers, vel, yaw, resid, size_bin


if __name__ == "__main__":
    featsize = 32
    num_size_bins = 4
    num_seqs = 2          # B
    frames_per_seq = 4    # T
    num_frames = num_seqs * frames_per_seq            # 8
    # Ragged points-per-frame so frames straddle point-tile boundaries and the
    # cross-tile running-max accumulator path is exercised.
    counts = jnp.array([10, 14, 12, 12, 8, 16, 12, 12], dtype=jnp.int32)
    num_points = int(counts.sum())                     # 96

    key = jax.random.PRNGKey(0)
    kp, kx, kc, ky = jax.random.split(key, 4)

    params = init_params(kp, featsize, num_size_bins)
    fused = fuse_params(params)

    x = jax.random.normal(kx, (num_points, featsize), jnp.float32)
    point2frameidx = jnp.repeat(jnp.arange(num_frames, dtype=jnp.int32), counts)
    frame2batchidx = jnp.repeat(jnp.arange(num_seqs, dtype=jnp.int32),
                                frames_per_seq)

    # bboxes_in: center / cos_yaw / sin_yaw per frame
    bb_center = jax.random.normal(kc, (num_frames, 3), jnp.float32)
    yaw_angle = jax.random.uniform(ky, (num_frames,), jnp.float32, -3.14, 3.14)
    bb_cos = jnp.cos(yaw_angle)
    bb_sin = jnp.sin(yaw_angle)

    outs = refinement_bbox_regression(
        fused, x, bb_center, bb_cos, bb_sin,
        point2frameidx, frame2batchidx, num_frames, num_seqs, tile_n=32)
    outs = jax.block_until_ready(outs)

    refs = reference(params, x, bb_center, bb_cos, bb_sin,
                     point2frameidx, frame2batchidx, num_frames, num_seqs)
    names = ("centers", "velocities", "yaw_sincos", "size_residual", "size_bin")
    for name, o, r in zip(names, outs, refs):
        assert o.shape == r.shape, (name, o.shape, r.shape)
        err = float(jnp.max(jnp.abs(o - r)))
        assert jnp.allclose(o, r, rtol=5e-3, atol=5e-3), (name, err)

    print("KERNEL_OK")
</pallas_src>

<mosaic_0001>
module attributes {stable_mosaic.version = 11 : i64} {
  func.func @_fused_kernel(%arg0: i32, %arg1: memref<3xi32, #tpu.memory_space<smem>>, %arg2: memref<3xi32, #tpu.memory_space<smem>>, %arg3: memref<32x32xf32, #tpu.memory_space<vmem>>, %arg4: memref<32x1xi32, #tpu.memory_space<vmem>>, %arg5: memref<8x1xi32, #tpu.memory_space<vmem>>, %arg6: memref<8x8xf32, #tpu.memory_space<vmem>>, %arg7: memref<32x8xf32, #tpu.memory_space<vmem>>, %arg8: memref<1x8xf32, #tpu.memory_space<vmem>>, %arg9: memref<32x16xf32, #tpu.memory_space<vmem>>, %arg10: memref<1x16xf32, #tpu.memory_space<vmem>>, %arg11: memref<8x8xf32, #tpu.memory_space<vmem>>, %arg12: memref<2x16xf32, #tpu.memory_space<vmem>>, %arg13: memref<8x32xf32, #tpu.memory_space<vmem>>, %arg14: memref<2x32xf32, #tpu.memory_space<vmem>>) attributes {dimension_semantics = [#tpu.dimension_semantics<arbitrary>], iteration_bounds = array<i64: 3>, scalar_prefetch = 2 : i64, scratch_operands = 2 : i64, tpu.core_type = #tpu.core_type<tc>, window_params = [{transform_indices = @transform_0, window_bounds = array<i64: 32, 32>}, {transform_indices = @transform_1, window_bounds = array<i64: 32, 1>}, {pipeline_mode = #tpu.pipeline_mode<synchronous>, transform_indices = @transform_2, window_bounds = array<i64: 8, 1>}, {pipeline_mode = #tpu.pipeline_mode<synchronous>, transform_indices = @transform_3, window_bounds = array<i64: 8, 8>}, {pipeline_mode = #tpu.pipeline_mode<synchronous>, transform_indices = @transform_4, window_bounds = array<i64: 32, 8>}, {pipeline_mode = #tpu.pipeline_mode<synchronous>, transform_indices = @transform_5, window_bounds = array<i64: 1, 8>}, {pipeline_mode = #tpu.pipeline_mode<synchronous>, transform_indices = @transform_6, window_bounds = array<i64: 32, 16>}, {pipeline_mode = #tpu.pipeline_mode<synchronous>, transform_indices = @transform_7, window_bounds = array<i64: 1, 16>}, {pipeline_mode = #tpu.pipeline_mode<synchronous>, transform_indices = @transform_8, window_bounds = array<i64: 8, 8>}, {pipeline_mode = #tpu.pipeline_mode<synchronous>, transform_indices = @transform_9, window_bounds = array<i64: 2, 16>}]} {
    %c0_i32 = arith.constant 0 : i32
    %0 = arith.cmpi eq, %arg0, %c0_i32 : i32
    %1 = arith.extui %0 : i1 to i32
    %c0_i32_0 = arith.constant 0 : i32
    %2 = arith.cmpi ne, %1, %c0_i32_0 : i32
    scf.if %2 {
      %cst = arith.constant -1.000000e+30 : f32
      %20 = vector.broadcast %cst : f32 to vector<8x32xf32>
      %c0_13 = arith.constant 0 : index
      %c0_14 = arith.constant 0 : index
      %21 = vector.load %arg13[%c0_13, %c0_14] : memref<8x32xf32, #tpu.memory_space<vmem>>, vector<8x32xf32>
      tpu.vector_store %arg13[%c0_13, %c0_14], %20 {strides = array<i32>} : memref<8x32xf32, #tpu.memory_space<vmem>>, vector<8x32xf32>,
    } else {
    }
    %c0 = arith.constant 0 : index
    %c0_1 = arith.constant 0 : index
    %3 = vector.load %arg3[%c0, %c0_1] : memref<32x32xf32, #tpu.memory_space<vmem>>, vector<32x32xf32>
    %c0_2 = arith.constant 0 : index
    %c0_3 = arith.constant 0 : index
    %4 = vector.load %arg4[%c0_2, %c0_3] : memref<32x1xi32, #tpu.memory_space<vmem>>, vector<32x1xi32>
    %5 = arith.index_cast %arg0 : i32 to index
    %6 = memref.load %arg1[%5] : memref<3xi32, #tpu.memory_space<smem>>
    %7 = arith.index_cast %arg0 : i32 to index
    %8 = memref.load %arg2[%7] : memref<3xi32, #tpu.memory_space<smem>>
    %9 = arith.subi %8, %6 : i32
    %c1_i32 = arith.constant 1 : i32
    %10 = arith.addi %9, %c1_i32 : i32
    %c0_i32_4 = arith.constant 0 : i32
    %11 = arith.subi %10, %c0_i32_4 : i32
    %c1_i32_5 = arith.constant 1 : i32
    %c1_i32_6 = arith.constant 1 : i32
    %12 = arith.subi %c1_i32_5, %c1_i32_6 : i32
    %13 = arith.addi %11, %12 : i32
    %c1_i32_7 = arith.constant 1 : i32
    %14 = arith.divsi %13, %c1_i32_7 : i32
    %c1_i32_8 = arith.constant 1 : i32
    %c0_i32_9 = arith.constant 0 : i32
    %c0_i32_10 = arith.constant 0 : i32
    %15 = arith.subi %14, %c0_i32_10 : i32
    %16 = arith.addi %c0_i32_10, %15 : i32
    %c1_i32_11 = arith.constant 1 : i32
    scf.for %arg15 = %c0_i32_10 to %16 step %c1_i32_11  : i32 {
      %20 = arith.muli %arg15, %c1_i32_8 : i32
      %21 = arith.addi %c0_i32_9, %20 : i32
      %22 = arith.addi %6, %21 : i32
      %23 = vector.broadcast %22 : i32 to vector<32x1xi32>
      %24 = arith.cmpi eq, %4, %23 : vector<32x1xi32>
      %cst = arith.constant -1.000000e+30 : f32
      %25 = vector.shape_cast %24 : vector<32x1xi1> to vector<32x1xi1>
      %26 = vector.broadcast %25 : vector<32x1xi1> to vector<32x32xi1>
      %27 = vector.broadcast %cst : f32 to vector<32x32xf32>
      %28 = arith.select %26, %3, %27 : vector<32x32xi1>, vector<32x32xf32>
      %cst_13 = arith.constant dense<0xFF800000> : vector<32xf32>
      %29 = vector.multi_reduction <maximumf>, %28, %cst_13 [0] : vector<32x32xf32> to vector<32xf32>
      %30 = vector.shape_cast %29 : vector<32xf32> to vector<1x32xf32>
      %31 = arith.index_cast %22 : i32 to index
      %c0_14 = arith.constant 0 : index
      %32 = vector.load %arg13[%31, %c0_14] : memref<8x32xf32, #tpu.memory_space<vmem>>, vector<1x32xf32>
      %33 = arith.maximumf %32, %30 : vector<1x32xf32>
      %34 = arith.index_cast %22 : i32 to index
      %c0_15 = arith.constant 0 : index
      %35 = vector.load %arg13[%34, %c0_15] : memref<8x32xf32, #tpu.memory_space<vmem>>, vector<1x32xf32>
      tpu.vector_store %arg13[%34, %c0_15], %33 {strides = array<i32>} : memref<8x32xf32, #tpu.memory_space<vmem>>, vector<1x32xf32>,
    }
    %c2_i32 = arith.constant 2 : i32
    %17 = arith.cmpi eq, %arg0, %c2_i32 : i32
    %18 = arith.extui %17 : i1 to i32
    %c0_i32_12 = arith.constant 0 : i32
    %19 = arith.cmpi ne, %18, %c0_i32_12 : i32
    scf.if %19 {
      %c0_13 = arith.constant 0 : index
      %c0_14 = arith.constant 0 : index
      %20 = vector.load %arg13[%c0_13, %c0_14] : memref<8x32xf32, #tpu.memory_space<vmem>>, vector<8x32xf32>
      %c0_15 = arith.constant 0 : index
      %c0_16 = arith.constant 0 : index
      %21 = vector.load %arg5[%c0_15, %c0_16] : memref<8x1xi32, #tpu.memory_space<vmem>>, vector<8x1xi32>
      %c0_i32_17 = arith.constant 0 : i32
      %22 = vector.broadcast %c0_i32_17 : i32 to vector<8x1xi32>
      %23 = arith.cmpi eq, %21, %22 : vector<8x1xi32>
      %cst = arith.constant -1.000000e+30 : f32
      %24 = vector.shape_cast %23 : vector<8x1xi1> to vector<8x1xi1>
      %25 = vector.broadcast %24 : vector<8x1xi1> to vector<8x32xi1>
      %26 = vector.broadcast %cst : f32 to vector<8x32xf32>
      %27 = arith.select %25, %20, %26 : vector<8x32xi1>, vector<8x32xf32>
      %cst_18 = arith.constant dense<0xFF800000> : vector<32xf32>
      %28 = vector.multi_reduction <maximumf>, %27, %cst_18 [0] : vector<8x32xf32> to vector<32xf32>
      %29 = vector.shape_cast %28 : vector<32xf32> to vector<1x32xf32>
      %c0_19 = arith.constant 0 : index
      %c0_20 = arith.constant 0 : index
      %30 = vector.load %arg14[%c0_19, %c0_20] : memref<2x32xf32, #tpu.memory_space<vmem>>, vector<1x32xf32>
      tpu.vector_store %arg14[%c0_19, %c0_20], %29 {strides = array<i32>} : memref<2x32xf32, #tpu.memory_space<vmem>>, vector<1x32xf32>,
      %c1_i32_21 = arith.constant 1 : i32
      %31 = vector.broadcast %c1_i32_21 : i32 to vector<8x1xi32>
      %32 = arith.cmpi eq, %21, %31 : vector<8x1xi32>
      %cst_22 = arith.constant -1.000000e+30 : f32
      %33 = vector.shape_cast %32 : vector<8x1xi1> to vector<8x1xi1>
      %34 = vector.broadcast %33 : vector<8x1xi1> to vector<8x32xi1>
      %35 = vector.broadcast %cst_22 : f32 to vector<8x32xf32>
      %36 = arith.select %34, %20, %35 : vector<8x32xi1>, vector<8x32xf32>
      %cst_23 = arith.constant dense<0xFF800000> : vector<32xf32>
      %37 = vector.multi_reduction <maximumf>, %36, %cst_23 [0] : vector<8x32xf32> to vector<32xf32>
      %38 = vector.shape_cast %37 : vector<32xf32> to vector<1x32xf32>
      %c1 = arith.constant 1 : index
      %c0_24 = arith.constant 0 : index
      %39 = vector.load %arg14[%c1, %c0_24] : memref<2x32xf32, #tpu.memory_space<vmem>>, vector<1x32xf32>
      tpu.vector_store %arg14[%c1, %c0_24], %38 {strides = array<i32>} : memref<2x32xf32, #tpu.memory_space<vmem>>, vector<1x32xf32>,
      %c0_25 = arith.constant 0 : index
      %c0_26 = arith.constant 0 : index
      %40 = vector.load %arg7[%c0_25, %c0_26] : memref<32x8xf32, #tpu.memory_space<vmem>>, vector<32x8xf32>
      %cst_27 = arith.constant dense<0.000000e+00> : vector<8x8xf32>
      %41 = tpu.matmul %20, %40, %cst_27 {dimension_numbers = #tpu.dot_dimension_numbers<[1], [0], [0], [1], [0, 0, 1, 1], [], []>} : vector<8x32xf32>, vector<32x8xf32>, vector<8x8xf32> -> vector<8x8xf32>
      %c0_28 = arith.constant 0 : index
      %c0_29 = arith.constant 0 : index
      %42 = vector.load %arg8[%c0_28, %c0_29] : memref<1x8xf32, #tpu.memory_space<vmem>>, vector<1x8xf32>
      %43 = vector.broadcast %42 : vector<1x8xf32> to vector<8x8xf32>
      %44 = arith.addf %41, %43 : vector<8x8xf32>
      %c0_30 = arith.constant 0 : index
      %c0_31 = arith.constant 0 : index
      %45 = vector.load %arg6[%c0_30, %c0_31] : memref<8x8xf32, #tpu.memory_space<vmem>>, vector<8x8xf32>
      %46 = vector.extract_strided_slice %45 {offsets = [0, 6], sizes = [8, 1], strides = [1, 1]} : vector<8x8xf32> to vector<8x1xf32>
      %47 = vector.extract_strided_slice %45 {offsets = [0, 7], sizes = [8, 1], strides = [1, 1]} : vector<8x8xf32> to vector<8x1xf32>
      %48 = vector.extract_strided_slice %44 {offsets = [0, 6], sizes = [8, 1], strides = [1, 1]} : vector<8x8xf32> to vector<8x1xf32>
      %49 = vector.extract_strided_slice %44 {offsets = [0, 7], sizes = [8, 1], strides = [1, 1]} : vector<8x8xf32> to vector<8x1xf32>
      %50 = arith.mulf %46, %48 : vector<8x1xf32>
      %51 = arith.mulf %47, %49 : vector<8x1xf32>
      %52 = arith.addf %50, %51 : vector<8x1xf32>
      %cst_32 = arith.constant 0.000000e+00 : f32
      %53 = vector.broadcast %cst_32 : f32 to vector<8x1xf32>
      %54 = arith.subf %53, %47 : vector<8x1xf32>
      %55 = arith.mulf %54, %48 : vector<8x1xf32>
      %56 = arith.mulf %46, %49 : vector<8x1xf32>
      %57 = arith.addf %55, %56 : vector<8x1xf32>
      %58 = tpu.iota {dimensions = array<i32: 1>} : vector<8x8xi32>
      %c6_i32 = arith.constant 6 : i32
      %59 = vector.broadcast %c6_i32 : i32 to vector<8x8xi32>
      %60 = arith.cmpi eq, %58, %59 : vector<8x8xi32>
      %c7_i32 = arith.constant 7 : i32
      %61 = vector.broadcast %c7_i32 : i32 to vector<8x8xi32>
      %62 = arith.cmpi eq, %58, %61 : vector<8x8xi32>
      %63 = arith.addf %44, %45 : vector<8x8xf32>
      %64 = vector.shape_cast %57 : vector<8x1xf32> to vector<8x1xf32>
      %65 = vector.broadcast %64 : vector<8x1xf32> to vector<8x8xf32>
      %66 = arith.select %62, %65, %63 : vector<8x8xi1>, vector<8x8xf32>
      %67 = vector.shape_cast %52 : vector<8x1xf32> to vector<8x1xf32>
      %68 = vector.broadcast %67 : vector<8x1xf32> to vector<8x8xf32>
      %69 = arith.select %60, %68, %66 : vector<8x8xi1>, vector<8x8xf32>
      %c0_33 = arith.constant 0 : index
      %c0_34 = arith.constant 0 : index
      %70 = vector.load %arg11[%c0_33, %c0_34] : memref<8x8xf32, #tpu.memory_space<vmem>>, vector<8x8xf32>
      tpu.vector_store %arg11[%c0_33, %c0_34], %69 {strides = array<i32>} : memref<8x8xf32, #tpu.memory_space<vmem>>, vector<8x8xf32>,
      %c0_35 = arith.constant 0 : index
      %c0_36 = arith.constant 0 : index
      %71 = vector.load %arg14[%c0_35, %c0_36] : memref<2x32xf32, #tpu.memory_space<vmem>>, vector<2x32xf32>
      %c0_37 = arith.constant 0 : index
      %c0_38 = arith.constant 0 : index
      %72 = vector.load %arg9[%c0_37, %c0_38] : memref<32x16xf32, #tpu.memory_space<vmem>>, vector<32x16xf32>
      %cst_39 = arith.constant dense<0.000000e+00> : vector<2x16xf32>
      %73 = tpu.matmul %71, %72, %cst_39 {dimension_numbers = #tpu.dot_dimension_numbers<[1], [0], [0], [1], [0, 0, 1, 1], [], []>} : vector<2x32xf32>, vector<32x16xf32>, vector<2x16xf32> -> vector<2x16xf32>
      %c0_40 = arith.constant 0 : index
      %c0_41 = arith.constant 0 : index
      %74 = vector.load %arg10[%c0_40, %c0_41] : memref<1x16xf32, #tpu.memory_space<vmem>>, vector<1x16xf32>
      %75 = vector.broadcast %74 : vector<1x16xf32> to vector<2x16xf32>
      %76 = arith.addf %73, %75 : vector<2x16xf32>
      %77 = tpu.iota {dimensions = array<i32: 1>} : vector<2x16xi32>
      %c12_i32 = arith.constant 12 : i32
      %78 = vector.broadcast %c12_i32 : i32 to vector<2x16xi32>
      %79 = arith.cmpi sge, %77, %78 : vector<2x16xi32>
      %cst_42 = arith.constant -1.000000e+30 : f32
      %80 = vector.broadcast %cst_42 : f32 to vector<2x16xf32>
      %81 = arith.select %79, %76, %80 : vector<2x16xi1>, vector<2x16xf32>
      %cst_43 = arith.constant dense<0xFF800000> : vector<2xf32>
      %82 = vector.multi_reduction <maximumf>, %81, %cst_43 [1] : vector<2x16xf32> to vector<2xf32>
      %83 = vector.shape_cast %82 : vector<2xf32> to vector<2x1xf32>
      %84 = vector.broadcast %83 : vector<2x1xf32> to vector<2x16xf32>
      %85 = arith.subf %76, %84 : vector<2x16xf32>
      %cst_44 = arith.constant -1.000000e+30 : f32
      %86 = vector.broadcast %cst_44 : f32 to vector<2x16xf32>
      %87 = arith.select %79, %85, %86 : vector<2x16xi1>, vector<2x16xf32>
      %88 = math.exp %87 : vector<2x16xf32>
      %cst_45 = arith.constant dense<0.000000e+00> : vector<2xf32>
      %89 = vector.multi_reduction <add>, %88, %cst_45 [1] : vector<2x16xf32> to vector<2xf32>
      %90 = vector.shape_cast %89 : vector<2xf32> to vector<2x1xf32>
      %91 = tpu.reciprocal %90 {approx = true} : vector<2x1xf32> -> vector<2x1xf32>
      %92 = vector.broadcast %91 : vector<2x1xf32> to vector<2x16xf32>
      %93 = arith.mulf %88, %92 : vector<2x16xf32>
      %94 = arith.select %79, %93, %76 : vector<2x16xi1>, vector<2x16xf32>
      %c0_46 = arith.constant 0 : index
      %c0_47 = arith.constant 0 : index
      %95 = vector.load %arg12[%c0_46, %c0_47] : memref<2x16xf32, #tpu.memory_space<vmem>>, vector<2x16xf32>
      tpu.vector_store %arg12[%c0_46, %c0_47], %94 {strides = array<i32>} : memref<2x16xf32, #tpu.memory_space<vmem>>, vector<2x16xf32>,
    } else {
    }
    return
  }
  func.func @transform_0(%arg0: i32, %arg1: memref<3xi32, #tpu.memory_space<smem>>, %arg2: memref<3xi32, #tpu.memory_space<smem>>) -> (i32, i32) {
    %c0_i32 = arith.constant 0 : i32
    %c0_i32_0 = arith.constant 0 : i32
    return %arg0, %c0_i32 : i32, i32
  }
  func.func @transform_1(%arg0: i32, %arg1: memref<3xi32, #tpu.memory_space<smem>>, %arg2: memref<3xi32, #tpu.memory_space<smem>>) -> (i32, i32) {
    %c0_i32 = arith.constant 0 : i32
    %c0_i32_0 = arith.constant 0 : i32
    return %arg0, %c0_i32 : i32, i32
  }
  func.func @transform_2(%arg0: i32, %arg1: memref<3xi32, #tpu.memory_space<smem>>, %arg2: memref<3xi32, #tpu.memory_space<smem>>) -> (i32, i32) {
    %c0_i32 = arith.constant 0 : i32
    %c0_i32_0 = arith.constant 0 : i32
    %c0_i32_1 = arith.constant 0 : i32
    return %c0_i32, %c0_i32_0 : i32, i32
  }
  func.func @transform_3(%arg0: i32, %arg1: memref<3xi32, #tpu.memory_space<smem>>, %arg2: memref<3xi32, #tpu.memory_space<smem>>) -> (i32, i32) {
    %c0_i32 = arith.constant 0 : i32
    %c0_i32_0 = arith.constant 0 : i32
    %c0_i32_1 = arith.constant 0 : i32
    return %c0_i32, %c0_i32_0 : i32, i32
  }
  func.func @transform_4(%arg0: i32, %arg1: memref<3xi32, #tpu.memory_space<smem>>, %arg2: memref<3xi32, #tpu.memory_space<smem>>) -> (i32, i32) {
    %c0_i32 = arith.constant 0 : i32
    %c0_i32_0 = arith.constant 0 : i32
    %c0_i32_1 = arith.constant 0 : i32
    return %c0_i32, %c0_i32_0 : i32, i32
  }
  func.func @transform_5(%arg0: i32, %arg1: memref<3xi32, #tpu.memory_space<smem>>, %arg2: memref<3xi32, #tpu.memory_space<smem>>) -> (i32, i32) {
    %c0_i32 = arith.constant 0 : i32
    %c0_i32_0 = arith.constant 0 : i32
    %c0_i32_1 = arith.constant 0 : i32
    return %c0_i32, %c0_i32_0 : i32, i32
  }
  func.func @transform_6(%arg0: i32, %arg1: memref<3xi32, #tpu.memory_space<smem>>, %arg2: memref<3xi32, #tpu.memory_space<smem>>) -> (i32, i32) {
    %c0_i32 = arith.constant 0 : i32
    %c0_i32_0 = arith.constant 0 : i32
    %c0_i32_1 = arith.constant 0 : i32
    return %c0_i32, %c0_i32_0 : i32, i32
  }
  func.func @transform_7(%arg0: i32, %arg1: memref<3xi32, #tpu.memory_space<smem>>, %arg2: memref<3xi32, #tpu.memory_space<smem>>) -> (i32, i32) {
    %c0_i32 = arith.constant 0 : i32
    %c0_i32_0 = arith.constant 0 : i32
    %c0_i32_1 = arith.constant 0 : i32
    return %c0_i32, %c0_i32_0 : i32, i32
  }
  func.func @transform_8(%arg0: i32, %arg1: memref<3xi32, #tpu.memory_space<smem>>, %arg2: memref<3xi32, #tpu.memory_space<smem>>) -> (i32, i32) {
    %c0_i32 = arith.constant 0 : i32
    %c0_i32_0 = arith.constant 0 : i32
    %c0_i32_1 = arith.constant 0 : i32
    return %c0_i32, %c0_i32_0 : i32, i32
  }
  func.func @transform_9(%arg0: i32, %arg1: memref<3xi32, #tpu.memory_space<smem>>, %arg2: memref<3xi32, #tpu.memory_space<smem>>) -> (i32, i32) {
    %c0_i32 = arith.constant 0 : i32
    %c0_i32_0 = arith.constant 0 : i32
    %c0_i32_1 = arith.constant 0 : i32
    return %c0_i32, %c0_i32_0 : i32, i32
  }
}

</mosaic_0001>

<bundles_post_ra>
// kernel: refinement_bbox_regression.1
= control target key start
LH: loop header
LB: loop body
LE: loop exit
PB: predicated region body
PF: predicated region fallthrough
CT: control target
= control target key end

     0   :  { %s1073_s0 = inlined_call_operand.vmem [shape: s32[3], index: 0, kind: input, shape index: {}]   ;;  %s1074_s2 = inlined_call_operand.vmem [shape: f32[96,32], index: 2, kind: input, shape index: {}]   ;;  %s1075_s3 = inlined_call_operand.vmem [shape: s32[96,1], index: 3, kind: input, shape index: {}]   ;;  %s1076_s4 = inlined_call_operand.vmem [shape: s32[8,1], index: 4, kind: input, shape index: {}]   ;;  %s1077_s5 = inlined_call_operand.vmem [shape: f32[8,8], index: 5, kind: input, shape index: {}]   ;;  %s1078_s6 = inlined_call_operand.vmem [shape: f32[32,8], index: 6, kind: input, shape index: {}]   ;;  %s1079_s7 = inlined_call_operand.vmem [shape: f32[1,8], index: 7, kind: input, shape index: {}]   ;;  %s1080_s8 = inlined_call_operand.vmem [shape: f32[32,16], index: 8, kind: input, shape index: {}]   ;;  %s1081_s9 = inlined_call_operand.vmem [shape: f32[1,16], index: 9, kind: input, shape index: {}]   ;;  %s1082_s10 = inlined_call_operand.vmem [shape: f32[8,8], index: 10, kind: output, shape index: {0}]   ;;  %s1083_s11 = inlined_call_operand.vmem [shape: f32[2,16], index: 11, kind: output, shape index: {1}]   ;;  %s1084_s1 = inlined_call_operand.vmem [shape: s32[3], index: 1, kind: input, shape index: {}]  }
   0x1   :  { %s17_s19 = sshll.u32 %s1073_s0, 4  ;;  %s21_s22 = sshll.u32 %s1084_s1, 4  ;;  %s18_s19 = int_to_ptr.vmem [resolvable:$true] %s17_s19  ;;  %s22_s22 = int_to_ptr.vmem [resolvable:$true] %s21_s22 }
   0x2   :  { %s841_s23 = scalar_lea.vmem %s18_s19, 16  ;;  %p846_p1 = scmp.lt.s32.totalorder %s18_s19, %s18_s19 }
   0x3   :  { %p842_p0 = scmp.ne.s32.totalorder %s18_s19, %s841_s23  ;;  %p847_p2 = scmp.lt.s32.totalorder %s841_s23, %s841_s23 }
   0x5   :  { %p848_p3 = por %p847_p2, %p846_p1 }
   0x7   :  { %p849_p4 = pnand %p848_p3, %p842_p0 }
   0x9   :  { %852 = shalt.err (!%p849_p4)  }
   0xa   :  { %s883_s24 = smov [#allocation5]   ;;  %s853_s25 = scalar_lea.vmem %s22_s22, 16 }
   0xb   :  { %20 = dma.vmem_to_smem %s18_s19, 16, %s883_s24, [#allocation4] }
   0xc   :  { %p854_p5 = scmp.ne.s32.totalorder %s22_s22, %s853_s25  ;;  %p858_p6 = scmp.lt.s32.totalorder %s22_s22, %s22_s22 }
   0xd   :  { %p859_p7 = scmp.lt.s32.totalorder %s853_s25, %s853_s25 }
   0xf   :  { %p860_p8 = por %p859_p7, %p858_p6 }
  0x11   :  { %p861_p9 = pnand %p860_p8, %p854_p5 }
  0x13   :  { %864 = shalt.err (!%p861_p9)  }
  0x14   :  { %s884_s0 = smov [#allocation6]  }
  0x15   :  { %24 = dma.vmem_to_smem %s22_s22, 16, %s884_s0, [#allocation4] }
  0x16   :  { %873 = dma.done.wait [#allocation4], 32 }
  0x17   :  { %874 = vsyncadd [#allocation4], 4294967264 }
  0x18   :  { %26 = sfence }
  0x19   :  { %s961_s1 = smov 0  }
  0x1a LB: > { %s967_s26 = sadd.s32 4294967295, %s877_s1   ;;  %p746_p10 = scmp.ge.s32.totalorder %s877_s1, 1  ;;  %s877_s1 = sphi %s961_s1, %s32_s1  }
  0x1b   : > { %p304_p11 = scmp.lt.s32.totalorder %s877_s1, 4 }
  0x1d   : > { %p305_p12 = pnand %p746_p10, %p304_p11 }
  0x1e   : > { %s747_s27 = sshll.u32 (!%p305_p12), %s967_s26, 2  ;;  %p751_p0 = scmp.ne.s32.totalorder (!%p305_p12), %s967_s26, 0 }
  0x1f   : > { %308 = sbr.rel (%p305_p12) target bundleno = 913 (0x391), region = 52  ;;  %p341_p13 = scmp.lt.s32.totalorder (!%p305_p12), %s747_s27, 11 }
  0x26   : > { %s1086_s27 = smov (!%p341_p13, %s747_s27), 11  ;;  %355 = sbr.rel (%p751_p0) target bundleno = 45 (0x2d), region = 56 }
  0x27   : > { %s748_s28 = sshll.u32 %s1086_s27, 3  ;;  %vm356_vm0 = vcmask (!%p751_p0), 261120   ;;  %v885_v0 = vmov (!%p751_p0), -1e+30  }
  0x28   : > { %s344_s12 = scalar_lea.vmem %s1074_s2, %s748_s28  ;;  %s350_s15 = scalar_lea.vmem %s1075_s3, %s748_s28  ;;  %357 = vst.msk [vmem:[#allocation2] sm:$0xff] (!%p751_p0), %vm356_vm0, %v885_v0 }
  0x2d PF: > { %v979_v1 = vld [vmem:[%s344_s12] sm:$0xff]  ;;  %v981_v2 = vld [vmem:[%s344_s12 + $0x8] sm:$0xff]  ;;  %v983_v3 = vld [vmem:[%s344_s12 + $0x10] sm:$0xff]  ;;  %s986_s16 = sld [smem:[#allocation5 + %s967_s26]] }
  0x2e   : > { %s367_s17 = sld [smem:[#allocation6 + %s967_s26]]  ;;  %v989_v4 = vld [vmem:[%s344_s12 + $0x18] sm:$0xff]  ;;  %v991_v5 = vld [vmem:[%s350_s15] sm:$0xff]  ;;  %v363_v6 = vld [vmem:[%s350_s15 + $0x8] sm:$0xff] }
  0x2f   : > { %v364_v7 = vld [vmem:[%s350_s15 + $0x10] sm:$0xff]  ;;  %v365_v8 = vld [vmem:[%s350_s15 + $0x18] sm:$0xff] }
  0x34   : > { %s368_s18 = ssub.s32 %s367_s17, %s986_s16 }
  0x35   : > { %s994_s19 = sadd.s32 1, %s368_s18 }
  0x36   : > { %p752_p1 = scmp.le.s32.totalorder %s994_s19, 0 }
  0x37   : > { %s997_s20 = smov (!%p752_p1), 0  }
  0x38   : > { %723 = sbr.rel (%p752_p1) target bundleno = 221 (0xdd), region = 99 }
  0x3f LB: >> { %v886_v9 = vmov 0   ;;  %s1004_s21 = sadd.s32 %s881_s20, %s986_s16  ;;  %vm406_vm7 = vcmask 261120   ;;  %vm423_vm10 = vcmask 253952   ;;  %s373_s20 = sadd.s32 1, %s881_s20   ;;  %s881_s20 = sphi %s997_s20, %s373_s20  }
  0x40   : >> { %833 = vset.pattern.permute.xlu1 %v886_v9  ;;  %832 = vset.pattern.permute.xlu0 %v886_v9  ;;  %v377_v10 = vstv %s1004_s21  ;;  %s420_s22 = scalar_lea.vmem [#allocation2], %s1004_s21  ;;  %p372_p2 = scmp.ge.s32.totalorder %s373_s20, %s994_s19 }
  0x41   : >> { %vm380_vm1 = vcmp.eq.s32.totalorder %v364_v7, %v377_v10  ;;  %vm378_vm2 = vcmp.eq.s32.totalorder %v991_v5, %v377_v10  ;;  %vm381_vm3 = vcmp.eq.s32.totalorder %v365_v8, %v377_v10  ;;  %vm379_vm4 = vcmp.eq.s32.totalorder %v363_v6, %v377_v10  ;;  %v421_v35 = vld [vmem:[%s420_s22] sm:$0x1] }
  0x42   : >> { %v384_v11 = vsel %vm380_vm1, 1, %v886_v9  ;;  %v382_v12 = vsel %vm378_vm2, 1, %v886_v9  ;;  %v385_v13 = vsel %vm381_vm3, 1, %v886_v9  ;;  %v383_v14 = vsel %vm379_vm4, 1, %v886_v9 }
  0x43   : >> { %393 = vperm.xlu1 %833, %v384_v11   ;;  %387 = vperm.xlu0 %832, %v382_v12  }
  0x47   : >> { %396 = vperm.xlu1 %833, %v385_v13   ;;  %390 = vperm.xlu0 %832, %v383_v14  }
  0xc2   : >> { %v394_v15 = vpop.permute.xlu1 %393  ;;  %v388_v16 = vpop.permute.xlu0 %387 }
  0xc3   : >> { %vm400_vm5 = vcmp.eq.s32.totalorder %v394_v15, 1  ;;  %vm398_vm6 = vcmp.eq.s32.totalorder %v388_v16, 1 }
  0xc4   : >> { %v404_v17 = vsel %vm400_vm5, %v983_v3, -1e+30  ;;  %v402_v18 = vsel %vm398_vm6, %v979_v1, -1e+30 }
  0xc5   : >> { %v409_v23 = vsel %vm406_vm7, %v404_v17, -inf  ;;  %v407_v24 = vsel %vm406_vm7, %v402_v18, -inf }
  0xc6   : >> { %v397_v19 = vpop.permute.xlu1 %396  ;;  %v391_v20 = vpop.permute.xlu0 %390 }
  0xc7   : >> { %vm401_vm8 = vcmp.eq.s32.totalorder %v397_v19, 1  ;;  %vm399_vm9 = vcmp.eq.s32.totalorder %v391_v20, 1 }
  0xc8   : >> { %v405_v21 = vsel %vm401_vm8, %v989_v4, -1e+30  ;;  %v403_v22 = vsel %vm399_vm9, %v981_v2, -1e+30 }
  0xc9   : >> { %v410_v25 = vsel %vm406_vm7, %v405_v21, -inf  ;;  %v408_v26 = vsel %vm406_vm7, %v403_v22, -inf }
  0xca   : >> { %v412_v27 = vmax.f32 %v409_v23, %v410_v25  ;;  %v411_v28 = vmax.f32 %v407_v24, %v408_v26 }
  0xcc   : >> { %v413_v29 = vmax.f32 %v411_v28, %v412_v27 }
  0xce   : >> { %v414_v30 = vrot.slane %v413_v29, 4 }
  0xd0   : >> { %v415_v31 = vmax.f32 %v413_v29, %v414_v30 }
  0xd2   : >> { %v416_v32 = vrot.slane %v415_v31, 2 }
  0xd4   : >> { %v417_v33 = vmax.f32 %v415_v31, %v416_v32 }
  0xd6   : >> { %v418_v34 = vrot.slane %v417_v33, 1  ;;  %375 = sbr.rel (!%p372_p2) target bundleno = 63 (0x3f), region = 105 }
  0xd8   : >> { %v419_v36 = vmax.f32 %v417_v33, %v418_v34 }
  0xda   : >> { %v422_v37 = vmax.f32 %v421_v35, %v419_v36 }
  0xdc   : >> { %424 = vst.msk [vmem:[%s420_s22] sm:$0x1] %vm423_vm10, %v422_v37 }
  0xdd PF: > { %p753_p3 = scmp.ne.s32.totalorder %s967_s26, 2 }
  0xde   : > { %v463_v38 = vld [vmem:[%s1078_s6] sm:$0xff] (!%p753_p3)  ;;  %v464_v39 = vld [vmem:[%s1078_s6 + $0x8] sm:$0xff] (!%p753_p3)  ;;  %v887_v41 = vmov (!%p753_p3), 0.0|0.0   ;;  %v888_v42 = vmov (!%p753_p3), 0   ;;  %v465_v44 = vld [vmem:[%s1078_s6 + $0x10] sm:$0xff] (!%p753_p3)  ;;  %vm889_vm13 = vmmov (!%p753_p3), 0   ;;  %v569_v21 = vlaneseq (!%p753_p3) }
  0xdf   : > { %428 = sbr.rel (%p753_p3) target bundleno = 913 (0x391), region = 67  ;;  %v430_v40 = vld [vmem:[%s1076_s4] sm:$0xff] (!%p753_p3)  ;;  %792 = vmatprep.subr.bf16.mxu0 (!%p753_p3), %v887_v41  ;;  %834 = vset.pattern.permute.xlu0 (!%p753_p3), %v888_v42  ;;  %v793_v43 = vpack.c.bf16 (!%p753_p3), %v464_v39, %v463_v38  ;;  %v466_v45 = vld [vmem:[%s1078_s6 + $0x18] sm:$0xff] (!%p753_p3)  ;;  %v890_v47 = vmov (!%p753_p3), 0.0   ;;  %vm438_vm14 = vcmask (!%p753_p3), 261120   ;;  %v590_v52 = vld [vmem:[%s1080_s8 + $0x8] sm:$0xff] (!%p753_p3) }
  0xe0   : > { %vm431_vm11 = vcmp.eq.s32.totalorder (!%p753_p3), %v430_v40, 0  ;;  %vm448_vm12 = vcmp.eq.s32.totalorder (!%p753_p3), %v430_v40, 1  ;;  %778 = vmatprep.mubr.msk.f32.mxu0 (!%p753_p3), %vm889_vm13, %v890_v47  ;;  %798 = vmatprep.subr.bf16.mxu1 (!%p753_p3), %v887_v41  ;;  %v796_v48 = vpack.c.bf16 (!%p753_p3), %v466_v45, %v465_v44  ;;  %v589_v51 = vld [vmem:[%s1080_s8] sm:$0xff] (!%p753_p3)  ;;  %v591_v54 = vld [vmem:[%s1080_s8 + $0x10] sm:$0xff] (!%p753_p3)  ;;  %v592_v55 = vld [vmem:[%s1080_s8 + $0x18] sm:$0xff] (!%p753_p3)  ;;  %vm446_vm1 = vcmask (!%p753_p3), 253952  }
  0xe1   : > { %v432_v46 = vsel (!%p753_p3), %vm431_vm11, 1, %v888_v42  ;;  %794 = vmatpush3.bf16.msra.mxu0 (!%p753_p3), %v793_v43  ;;  %v449_v49 = vsel (!%p753_p3), %vm448_vm12, 1, %v888_v42  ;;  %789 = vmatprep.mubr.msk.f32.mxu1 (!%p753_p3), %vm889_vm13, %v890_v47  ;;  %v799_v53 = vpack.c.bf16 (!%p753_p3), %v590_v52, %v589_v51  ;;  %v802_v56 = vpack.c.bf16 (!%p753_p3), %v592_v55, %v591_v54  ;;  %v754_v12 = vld [vmem:[%s1079_s7] ss:$0 sm:$0xff] (!%p753_p3)  ;;  %s891_s23 = smov (!%p753_p3), 127   ;;  %s892_s24 = smov (!%p753_p3), 1  }
  0xe2   : > { %434 = vperm.xlu0 (!%p753_p3), %834, %v432_v46   ;;  %795 = vmatprep.subr.bf16.mxu0 (!%p753_p3), %v887_v41  ;;  %v893_v16 = vmov (!%p753_p3), 7   ;;  %v547_v17 = vld [vmem:[%s1077_s5] sm:$0xff] (!%p753_p3)  ;;  %v570_v22 = vand.u32 (!%p753_p3), 127, %v569_v21  ;;  %vm675_vm3 = vcmask (!%p753_p3), 123904   ;;  %v894_v29 = vmov (!%p753_p3), 6  }
  0xe3   : > { %v429_v50 = vld [vmem:[#allocation2] sm:$0xff] (!%p753_p3)  ;;  %800 = vmatpush3.bf16.msra.mxu1 (!%p753_p3), %v799_v53  ;;  %835 = vset.pattern.permute.xlu1 (!%p753_p3), %v893_v16  ;;  %v554_v30 = vsub.f32 (!%p753_p3), 0.0, %v547_v17  ;;  %vm586_vm6 = vcmask (!%p753_p3), 64512  }
  0xe4   : > { %801 = vmatprep.subr.bf16.mxu1 (!%p753_p3), %v887_v41  ;;  %v756_v23 = vld [vmem:[%s1081_s9] ss:$0 sm:$0xff] (!%p753_p3)  ;;  %vm673_vm2 = vcmp.ge.s32.totalorder (!%p753_p3), %v570_v22, 12  ;;  %vm572_vm4 = vcmp.eq.s32.totalorder (!%p753_p3), %v570_v22, 7  ;;  %vm571_vm5 = vcmp.eq.s32.totalorder (!%p753_p3), %v570_v22, 6 }
  0xe5   : > { %797 = vmatpush3.bf16.msra.mxu0 (!%p753_p3), %v796_v48 }
  0xe6   : > { %451 = vperm.xlu0 %834, %v449_v49  }
  0xe7   : > { %803 = vmatpush3.bf16.msra.mxu1 %v802_v56 }
  0xe8   : > { %779 = vmatmul.mubr.msk.f32.vlgmr.msra.gmra.mrb[0].mxu0 %vm438_vm14, %v429_v50 }
  0xea   : > { %836 = vset.pattern.permute.xlu0 %v894_v29 }
 0x161   : > { %v435_v57 = vpop.permute.xlu0 %434 }
 0x162   : > { %vm436_vm15 = vcmp.eq.s32.totalorder %v435_v57, 1 }
 0x163   : > { %v437_v58 = vsel %vm436_vm15, %v429_v50, -1e+30 }
 0x164   : > { %v439_v59 = vsel %vm438_vm14, %v437_v58, -inf }
 0x165   : > { %v440_v60 = vrot.slane %v439_v59, 4  ;;  %v452_v61 = vpop.permute.xlu0 %451 }
 0x166   : > { %vm453_vm0 = vcmp.eq.s32.totalorder %v452_v61, 1 }
 0x167   : > { %v441_v62 = vmax.f32 %v439_v59, %v440_v60  ;;  %v454_v63 = vsel %vm453_vm0, %v429_v50, -1e+30 }
 0x168   : > { %v455_v0 = vsel %vm438_vm14, %v454_v63, -inf }
 0x169   : > { %v442_v1 = vrot.slane %v441_v62, 2  ;;  %v456_v2 = vrot.slane %v455_v0, 4 }
 0x16b   : > { %v443_v3 = vmax.f32 %v441_v62, %v442_v1  ;;  %v457_v4 = vmax.f32 %v455_v0, %v456_v2 }
 0x16d   : > { %v444_v5 = vrot.slane %v443_v3, 1  ;;  %v458_v6 = vrot.slane %v457_v4, 2 }
 0x16f   : > { %v445_v7 = vmax.f32 %v443_v3, %v444_v5  ;;  %v459_v8 = vmax.f32 %v457_v4, %v458_v6 }
 0x171   : > { %447 = vst.msk [vmem:[#allocation3] sm:$0x1] %vm446_vm1, %v445_v7  ;;  %v460_v9 = vrot.slane %v459_v8, 1 }
 0x173   : > { %v461_v10 = vmax.f32 %v459_v8, %v460_v9 }
 0x175   : > { %462 = vst.msk [vmem:[#allocation3 + $0x1] sm:$0x1] %vm446_vm1, %v461_v10 }
 0x17c   : > { %v588_v11 = vld [vmem:[#allocation3] sm:$0x3] }
 0x17d   : > { %790 = vmatmul.mubr.msk.f32.vlgmr.msra.gmra.mrb[0].mxu1 %vm438_vm14, %v588_v11 }
 0x1bb   : > { %v543_v13 = vpop.f32.mrb[0].mxu0 }
 0x1bc   : > { %v544_v14 = vadd.f32 %v754_v12, %v543_v13  ;;  %v780_v15 = vpop.f32.mrb[1].mxu0 }
 0x1be   : > { %560 = vrot.lane.b32.xlu1 %v544_v14, %s891_s23  ;;  %556 = vrot.lane.b32.xlu0 %v544_v14, %s892_s24  ;;  %v548_v20 = vmul.f32 %v547_v17, %v544_v14  ;;  %v573_v45 = vadd.f32 %v547_v17, %v544_v14 }
 0x230   : > { %v561_v18 = vpop.permute.xlu1 %560  ;;  %v557_v31 = vpop.permute.xlu0 %556 }
 0x231   : > { %v563_v19 = vmul.f32 %v561_v18, %v547_v17  ;;  %v559_v32 = vmul.f32 %v557_v31, %v554_v30 }
 0x233   : > { %565 = vrot.lane.b32.xlu0 %v563_v19, %s892_s24 }
 0x237   : > { %550 = vrot.lane.b32.xlu0 %v548_v20, %s891_s23 }
 0x250   : > { %v669_v24 = vpop.f32.mrb[0].mxu1 }
 0x251   : > { %v670_v25 = vadd.f32 %v756_v23, %v669_v24  ;;  %v791_v26 = vpop.f32.mrb[1].mxu1 }
 0x253   : > { %v674_v27 = vsel %vm673_vm2, %v670_v25, -1e+30 }
 0x254   : > { %v676_v28 = vsel %vm675_vm3, %v674_v27, -inf }
 0x255   : > { %677 = vmax.xlane.f32.xlu1 %v676_v28 }
 0x2a5   : > { %v566_v33 = vpop.permute.xlu0 %565 }
 0x2a6   : > { %v568_v34 = vadd.f32 %v566_v33, %v559_v32 }
 0x2a8   : > { %576 = vperm.xlu1 %835, %v568_v34  }
 0x2a9   : > { %v551_v41 = vpop.permute.xlu0 %550 }
 0x2aa   : > { %v553_v42 = vadd.f32 %v551_v41, %v548_v20 }
 0x2e2   : > { %v678_v35 = vpop.xlane.xlu1 %677 }
 0x2e3   : > { %v679_v36 = vsub.f32 %v670_v25, %v678_v35 }
 0x2e5   : > { %v680_v37 = vsel %vm673_vm2, %v679_v36, -1e+30 }
 0x2e6   : > { %v681_v38 = vmul.f32 1.442695, %v680_v37 }
 0x2e8   : > { %837 = vpow2.f32 %v681_v38 }
 0x2f2   : > { %v838_v39 = vpop.eup %837 }
 0x2f3   : > { %v683_v40 = vsel %vm675_vm3, %v838_v39, 0.0 }
 0x2f4   : > { %684 = vadd.xlane.f32.xlu0 %v683_v40 }
 0x30a   : > { %582 = vperm.xlu0 %836, %v553_v42  }
 0x327   : > { %v577_v44 = vpop.permute.xlu1 %576 }
 0x328   : > { %v579_v46 = vsel %vm572_vm4, %v577_v44, %v573_v45 }
 0x381   : > { %v685_v43 = vpop.xlane.xlu0 %684 }
 0x382   : > { %839 = vrcp.f32 %v685_v43 }
 0x389   : > { %v583_v47 = vpop.permute.xlu0 %582 }
 0x38a   : > { %v585_v48 = vsel %vm571_vm5, %v583_v47, %v579_v46 }
 0x38b   : > { %587 = vst.msk [vmem:[%s1082_s10] sm:$0xff] %vm586_vm6, %v585_v48 }
 0x38c   : > { %v840_v49 = vpop.eup %839 }
 0x38d   : > { %v687_v50 = vmul.f32 %v840_v49, %v838_v39 }
 0x38f   : > { %v688_v51 = vsel %vm673_vm2, %v687_v50, %v670_v25 }
 0x390   : > { %689 = vst.msk [vmem:[%s1083_s11] sm:$0x3] %vm675_vm3, %v688_v51 }
 0x391 PF: > { %s32_s1 = sadd.s32 1, %s877_s1  }
 0x392   : > { %p29_p4 = scmp.ge.s32.totalorder %s32_s1, 5  }
 0x394   :  { %31 = sbr.rel (!%p29_p4) target bundleno = 26 (0x1a), region = 116 }

</bundles_post_ra>
